<compile_context>
chip_gen: v7x
topology: tpu7x:2x2x1
jax: 0.10.0
libtpu: 0.0.40
codegen_flags: <defaults>
</compile_context>

<pallas_src>
import functools
import math

import jax
import jax.numpy as jnp
from jax.experimental import pallas as pl
from jax.experimental.pallas import tpu as pltpu

RPAD = 0  # relation_vocab['PAD']


def _round_up(x, m):
  return ((x + m - 1) // m) * m


def _pick_batch_tile(B):
  """Rows per grid step.

  v5e/v6e (128 MiB VMEM): up to 256-512 rows is profitable; we cap at 256 so
  the same choice is VMEM-safe on v7x (64 MiB). For B > 16 we force >= 2 grid
  steps so the "parallel" batch axis can shard across v7x's 2 TensorCores.
  """
  Bp8 = _round_up(max(B, 1), 8)
  if Bp8 <= 16:
    return Bp8
  half = _round_up((Bp8 + 1) // 2, 8)
  return min(256, half)


def agent_forward_kernel(
    # ---- batch-tiled inputs (per grid step) ----
    g0in_ref,       # [BT, 2E+H]   (pre_rel_emb | curr_ent_emb | h0)
    s_ref,          # [BT, 3E]     (pre_rel_emb | curr_ent_emb | query_rel_emb)
    hstate_ref,     # [BT, 3H]     (h1 | c0 | c1)
    action_t_ref,   # [BT, 2E, Ap] lane-dense action axis (bf16 or f32)
    next_rels_ref,  # [BT, Ap] int32
    # ---- resident weights (constant index_map) ----
    w0_ref, b0_ref,             # [2E+H, 4H], [1, 4H]  fused LSTM-0 (i,f,o,g cols)
    w1l_ref, b1_ref,            # [2H, 4H],   [1, 4H]  fused LSTM-1 (i,f,o,g cols)
    w1h_ref, w1s_ref, bb1_ref,  # [H, 4H], [3E, 4H], [1, 4H]
    w2_ref, bb2_ref,            # [4H, 2E], [1, 2E]
    # ---- outputs ----
    probs_ref,      # [BT, Ap]
    states_ref,     # [BT, 4H]  packed (h0 | c0 | h1 | c1)
    *, hidden_size, rpad):
  H = hidden_size

  h1 = hstate_ref[:, 0 * H:1 * H]
  c0 = hstate_ref[:, 1 * H:2 * H]
  c1 = hstate_ref[:, 2 * H:3 * H]

  def lstm_cell(gates, c_prev):
    # Gate columns were permuted (i,f,g,o)->(i,f,o,g) in the wrapper, so one
    # sigmoid pass covers i|f|o and one tanh pass covers g (2 EUP passes).
    ifo = jax.nn.sigmoid(gates[:, :3 * H])
    g = jnp.tanh(gates[:, 3 * H:])
    i = ifo[:, 0 * H:1 * H]
    f = ifo[:, 1 * H:2 * H]
    o = ifo[:, 2 * H:3 * H]
    c_new = f * c_prev + i * g
    h_new = o * jnp.tanh(c_new)
    return h_new, c_new

  # ---- LSTM layer 0: one fused matmul over (x0 | h0)
  gates0 = jnp.dot(g0in_ref[...], w0_ref[...],
                   preferred_element_type=jnp.float32) + b0_ref[...]
  h0n, c0n = lstm_cell(gates0, c0)

  # ---- LSTM layer 1: one fused matmul over (h0_new | h1)
  x1 = jnp.concatenate([h0n, h1], axis=1)               # [BT, 2H]
  gates1 = jnp.dot(x1, w1l_ref[...],
                   preferred_element_type=jnp.float32) + b1_ref[...]
  h1n, c1n = lstm_cell(gates1, c1)

  # ---- hidden_1 / hidden_2 MLP head (all f32)
  hid = jnp.maximum(
      jnp.dot(h1n, w1h_ref[...], preferred_element_type=jnp.float32)
      + jnp.dot(s_ref[...], w1s_ref[...], preferred_element_type=jnp.float32)
      + bb1_ref[...], 0.0)                               # relu(hidden_1)
  pred = jnp.maximum(
      jnp.dot(hid, w2_ref[...], preferred_element_type=jnp.float32)
      + bb2_ref[...], 0.0)                               # relu(hidden_2) [BT,2E]

  # ---- logits[b,a] = sum_e action_t[b,e,a] * pred[b,e]
  # lane-dense action axis, sublane reduction; upcast bf16->f32 so the same
  # path is valid on v5e (no bf16 VPU) as well as v6e/v7x.
  at = action_t_ref[...].astype(jnp.float32)
  logits = jnp.sum(at * pred[:, :, None], axis=1)        # [BT, Ap]

  # ---- mask PAD actions (padded action columns carry rpad too) + softmax
  logits = jnp.where(next_rels_ref[...] == rpad, -99999.0, logits)
  m = jnp.max(logits, axis=-1, keepdims=True)
  e = jnp.exp(logits - m)
  # exact reciprocal: probs feed sampling / log-prob terms in the RL loss.
  probs = e * pl.reciprocal(jnp.sum(e, axis=-1, keepdims=True))

  probs_ref[...] = probs
  # one lane-dense [BT, 4H] store instead of four sub-128-lane stores
  states_ref[...] = jnp.concatenate([h0n, c0n, h1n, c1n], axis=1)


def agent_forward(params, next_rels, next_ents, pre_states, pre_rels,
                  query_rels, curr_ents, rpad=RPAD,
                  action_dtype=jnp.bfloat16):
  rel_emb = params["relation_emb"]
  ent_emb = params["entity_emb"]
  (h0, c0), (h1, c1) = pre_states

  B, A = next_rels.shape
  E = rel_emb.shape[1]
  H = h0.shape[1]

  BT = _pick_batch_tile(B)
  Bp = _round_up(B, BT)
  Ap = _round_up(A, 128)
  padB, padA = Bp - B, Ap - A

  # ---- pad INDEX arrays first so gathers write directly into padded buffers
  # (avoids a second full HBM pass over the dominant action tensor).
  next_rels_p = jnp.pad(next_rels.astype(jnp.int32), ((0, padB), (0, padA)),
                        constant_values=rpad)
  next_ents_p = jnp.pad(next_ents.astype(jnp.int32), ((0, padB), (0, padA)))
  pre_rels_p = jnp.pad(pre_rels.astype(jnp.int32), (0, padB))
  query_rels_p = jnp.pad(query_rels.astype(jnp.int32), (0, padB))
  curr_ents_p = jnp.pad(curr_ents.astype(jnp.int32), (0, padB))

  # TODO(synk): move these gathers into the kernel (PrefetchScalarGridSpec with
  # next_rels/next_ents as scalar prefetch + manual DMA from the embedding
  # tables) to remove the HBM round-trip of the action tensor entirely.
  next_rel_emb = jnp.take(rel_emb, next_rels_p, axis=0)        # [Bp, Ap, E]
  next_ent_emb = jnp.take(ent_emb, next_ents_p, axis=0)        # [Bp, Ap, E]
  # action tensor as [Bp, 2E, Ap]: action axis last (lane-dense, 128-mult.),
  # reduction axis on sublanes; streamed in bf16 (accumulation stays f32).
  action_t = jnp.concatenate(
      [jnp.swapaxes(next_rel_emb, 1, 2), jnp.swapaxes(next_ent_emb, 1, 2)],
      axis=1).astype(action_dtype)                             # [Bp, 2E, Ap]

  pre_rel_emb = jnp.take(rel_emb, pre_rels_p, axis=0)          # [Bp, E]
  curr_ent_emb = jnp.take(ent_emb, curr_ents_p, axis=0)        # [Bp, E]
  query_rel_emb = jnp.take(rel_emb, query_rels_p, axis=0)      # [Bp, E]

  def pad_rows(x):
    return jnp.pad(x, ((0, padB), (0, 0)))

  h0p, c0p, h1p, c1p = (pad_rows(t) for t in (h0, c0, h1, c1))

  # ---- pack per-row inputs into a few larger slabs (fewer per-step DMAs)
  g0in = jnp.concatenate([pre_rel_emb, curr_ent_emb, h0p], axis=1)          # [Bp, 2E+H]
  s = jnp.concatenate([pre_rel_emb, curr_ent_emb, query_rel_emb], axis=1)   # [Bp, 3E]
  hstate = jnp.concatenate([h1p, c0p, c1p], axis=1)                         # [Bp, 3H]

  # ---- weight packing: fuse (x@W_ih + h@W_hh) into one matmul per cell and
  # permute gate columns (i,f,g,o) -> (i,f,o,g).  (Precompute once outside the
  # rollout loop in production.)
  def permute_gates(w):
    return jnp.concatenate(
        [w[..., :2 * H], w[..., 3 * H:4 * H], w[..., 2 * H:3 * H]], axis=-1)

  w0 = permute_gates(jnp.concatenate([params["w_ih0"], params["w_hh0"]], 0))  # [2E+H,4H]
  b0 = permute_gates(params["b0"])
  w1l = permute_gates(jnp.concatenate([params["w_ih1"], params["w_hh1"]], 0))  # [2H,4H]
  b1 = permute_gates(params["b1"])
  w1h = params["w1"][:H, :]      # [H, 4H]
  w1s = params["w1"][H:, :]      # [3E, 4H]

  inputs = (
      g0in, s, hstate, action_t, next_rels_p,
      w0, b0, w1l, b1, w1h, w1s, params["bb1"], params["w2"], params["bb2"],
  )

  grid = (Bp // BT,)

  def batch_spec(shape):
    nz = len(shape) - 1
    block = (BT,) + tuple(shape[1:])
    return pl.BlockSpec(block, lambda i, nz=nz: (i,) + (0,) * nz)

  def weight_spec(shape):
    nd = len(shape)
    return pl.BlockSpec(tuple(shape), lambda i, nd=nd: (0,) * nd)

  in_specs = ([batch_spec(t.shape) for t in inputs[:5]]
              + [weight_spec(t.shape) for t in inputs[5:]])
  # TODO(synk): if the action_t DMA is still exposed in a profile, give its
  # batch_spec pipeline_mode=pl.Buffered(3) (deeper buffering on that input only).

  out_shape = (
      jax.ShapeDtypeStruct((Bp, Ap), jnp.float32),       # probs (lane-dense)
      jax.ShapeDtypeStruct((Bp, 4 * H), jnp.float32),    # packed h0|c0|h1|c1
  )
  out_specs = (
      pl.BlockSpec((BT, Ap), lambda i: (i, 0)),
      pl.BlockSpec((BT, 4 * H), lambda i: (i, 0)),
  )

  # Advisory cost estimate for the surrounding XLA schedule.
  flops = (2 * Bp * 4 * H * ((2 * E + H) + 2 * H + (H + 3 * E) + 2 * E)
           + 2 * Bp * 2 * E * Ap)
  transcendentals = Bp * (10 * H + Ap + 1)
  bytes_accessed = int(sum(int(a.size) * a.dtype.itemsize for a in inputs)
                       + 4 * (Bp * Ap + Bp * 4 * H))

  kernel = functools.partial(agent_forward_kernel, hidden_size=H, rpad=rpad)
  probs_p, states_p = pl.pallas_call(
      kernel,
      grid=grid,
      out_shape=out_shape,
      in_specs=in_specs,
      out_specs=out_specs,
      compiler_params=pltpu.CompilerParams(
          dimension_semantics=("parallel",),             # megacore on v7x
          vmem_limit_bytes=48 * 1024 * 1024),            # > default scoped, < v7x 64 MiB
      cost_estimate=pl.CostEstimate(
          flops=flops, transcendentals=transcendentals,
          bytes_accessed=bytes_accessed),
  )(*inputs)

  probs = probs_p[:B, :A]
  h0n = states_p[:B, 0 * H:1 * H]
  c0n = states_p[:B, 1 * H:2 * H]
  h1n = states_p[:B, 2 * H:3 * H]
  c1n = states_p[:B, 3 * H:4 * H]
  return probs, [(h0n, c0n), (h1n, c1n)]


# ---------------- pure-JAX reference (PyTorch-faithful, f32) ----------------
def reference_forward(params, next_rels, next_ents, pre_states, pre_rels,
                      query_rels, curr_ents, rpad=RPAD):
  rel_emb = params["relation_emb"]
  ent_emb = params["entity_emb"]
  next_rel_emb = jnp.take(rel_emb, next_rels, axis=0)
  next_ent_emb = jnp.take(ent_emb, next_ents, axis=0)
  action_emb = jnp.concatenate([next_rel_emb, next_ent_emb], axis=2)
  query_rel_emb = jnp.take(rel_emb, query_rels, axis=0)
  curr_ent_emb = jnp.take(ent_emb, curr_ents, axis=0)
  pre_rel_emb = jnp.take(rel_emb, pre_rels, axis=0)

  H = pre_states[0][0].shape[1]

  def lstm(x, h, c, w_ih, w_hh, b):
    g = x @ w_ih + h @ w_hh + b
    i = jax.nn.sigmoid(g[:, 0 * H:1 * H])
    f = jax.nn.sigmoid(g[:, 1 * H:2 * H])
    gg = jnp.tanh(g[:, 2 * H:3 * H])
    o = jax.nn.sigmoid(g[:, 3 * H:4 * H])
    c_new = f * c + i * gg
    return o * jnp.tanh(c_new), c_new

  x = jnp.concatenate([pre_rel_emb, curr_ent_emb], axis=1)
  (h0, c0), (h1, c1) = pre_states
  h0n, c0n = lstm(x, h0, c0, params["w_ih0"], params["w_hh0"], params["b0"])
  h1n, c1n = lstm(h0n, h1, c1, params["w_ih1"], params["w_hh1"], params["b1"])

  sfp = jnp.concatenate([h1n, pre_rel_emb, curr_ent_emb, query_rel_emb], axis=1)
  hid = jnp.maximum(sfp @ params["w1"] + params["bb1"], 0.0)
  pred = jnp.maximum(hid @ params["w2"] + params["bb2"], 0.0)
  logits = jnp.einsum("bae,be->ba", action_emb, pred)
  logits = jnp.where(next_rels == rpad, -99999.0, logits)
  probs = jax.nn.softmax(logits, axis=-1)
  return probs, [(h0n, c0n), (h1n, c1n)]


# ---------------- deterministic parameter init ----------------
def init_params(key, num_relation, num_entity, E, H):
  ks = jax.random.split(key, 16)

  def uni(k, shape, bound):
    return jax.random.uniform(k, shape, jnp.float32, -bound, bound)

  p = {}
  p["relation_emb"] = jax.random.normal(ks[0], (num_relation, E), jnp.float32)
  p["entity_emb"] = jax.random.normal(ks[1], (num_entity, E), jnp.float32)
  bl = 1.0 / math.sqrt(H)
  p["w_ih0"] = uni(ks[2], (2 * E, 4 * H), bl)
  p["w_hh0"] = uni(ks[3], (H, 4 * H), bl)
  p["b0"] = uni(ks[4], (1, 4 * H), bl) + uni(ks[5], (1, 4 * H), bl)  # b_ih + b_hh
  p["w_ih1"] = uni(ks[6], (H, 4 * H), bl)
  p["w_hh1"] = uni(ks[7], (H, 4 * H), bl)
  p["b1"] = uni(ks[8], (1, 4 * H), bl) + uni(ks[9], (1, 4 * H), bl)
  fin1 = H + 3 * E
  bh1 = 1.0 / math.sqrt(fin1)
  p["w1"] = uni(ks[10], (fin1, 4 * H), bh1)
  p["bb1"] = uni(ks[11], (1, 4 * H), bh1)
  bh2 = 1.0 / math.sqrt(4 * H)
  p["w2"] = uni(ks[12], (4 * H, 2 * E), bh2)
  p["bb2"] = uni(ks[13], (1, 2 * E), bh2)
  return p


if __name__ == "__main__":
  # small shapes: batch(*rollouts)=8, actions=8, embed=16, hidden=32, 2 policy layers
  B, A, E, H = 8, 8, 16, 32
  NUM_REL, NUM_ENT = 10, 12

  key = jax.random.PRNGKey(0)
  kp, k1, k2, k3, k4, k5 = jax.random.split(key, 6)
  params = init_params(kp, NUM_REL, NUM_ENT, E, H)

  next_rels = jax.random.randint(k1, (B, A), 1, NUM_REL, dtype=jnp.int32)
  next_rels = next_rels.at[:, -2:].set(RPAD)               # some PAD actions
  next_ents = jax.random.randint(k2, (B, A), 0, NUM_ENT, dtype=jnp.int32)
  pre_rels = jax.random.randint(k3, (B,), 1, NUM_REL, dtype=jnp.int32)
  query_rels = jax.random.randint(k4, (B,), 1, NUM_REL, dtype=jnp.int32)
  curr_ents = jax.random.randint(k5, (B,), 0, NUM_ENT, dtype=jnp.int32)
  pre_states = [(jnp.zeros((B, H), jnp.float32), jnp.zeros((B, H), jnp.float32))
                for _ in range(2)]

  probs, next_states = agent_forward(params, next_rels, next_ents, pre_states,
                                     pre_rels, query_rels, curr_ents)
  jax.block_until_ready((probs, next_states))

  ref_probs, ref_states = reference_forward(params, next_rels, next_ents,
                                            pre_states, pre_rels, query_rels,
                                            curr_ents)
  # probs tolerance loosened because action_emb streams through the kernel in
  # bfloat16 (f32 accumulation); LSTM states stay f32 end-to-end.
  assert jnp.allclose(probs, ref_probs, atol=2e-2, rtol=2e-2)
  for (h, c), (rh, rc) in zip(next_states, ref_states):
    assert jnp.allclose(h, rh, atol=1e-5, rtol=1e-5)
    assert jnp.allclose(c, rc, atol=1e-5, rtol=1e-5)

  print("KERNEL_OK")
</pallas_src>

<mosaic_0001>
module attributes {stable_mosaic.version = 11 : i64} {
  func.func @agent_forward_kernel(%arg0: i32, %arg1: memref<8x64xf32, #tpu.memory_space<vmem>>, %arg2: memref<8x48xf32, #tpu.memory_space<vmem>>, %arg3: memref<8x96xf32, #tpu.memory_space<vmem>>, %arg4: memref<8x32x128xbf16, #tpu.memory_space<vmem>>, %arg5: memref<8x128xi32, #tpu.memory_space<vmem>>, %arg6: memref<64x128xf32, #tpu.memory_space<vmem>>, %arg7: memref<1x128xf32, #tpu.memory_space<vmem>>, %arg8: memref<64x128xf32, #tpu.memory_space<vmem>>, %arg9: memref<1x128xf32, #tpu.memory_space<vmem>>, %arg10: memref<32x128xf32, #tpu.memory_space<vmem>>, %arg11: memref<48x128xf32, #tpu.memory_space<vmem>>, %arg12: memref<1x128xf32, #tpu.memory_space<vmem>>, %arg13: memref<128x32xf32, #tpu.memory_space<vmem>>, %arg14: memref<1x32xf32, #tpu.memory_space<vmem>>, %arg15: memref<8x128xf32, #tpu.memory_space<vmem>>, %arg16: memref<8x128xf32, #tpu.memory_space<vmem>>) attributes {dimension_semantics = [#tpu.dimension_semantics<parallel>], iteration_bounds = array<i64: 1>, scalar_prefetch = 0 : i64, scratch_operands = 0 : i64, tpu.core_type = #tpu.core_type<tc>, window_params = [{transform_indices = @transform_0, window_bounds = array<i64: 8, 64>}, {transform_indices = @transform_1, window_bounds = array<i64: 8, 48>}, {transform_indices = @transform_2, window_bounds = array<i64: 8, 96>}, {transform_indices = @transform_3, window_bounds = array<i64: 8, 32, 128>}, {transform_indices = @transform_4, window_bounds = array<i64: 8, 128>}, {pipeline_mode = #tpu.pipeline_mode<synchronous>, transform_indices = @transform_5, window_bounds = array<i64: 64, 128>}, {pipeline_mode = #tpu.pipeline_mode<synchronous>, transform_indices = @transform_6, window_bounds = array<i64: 1, 128>}, {pipeline_mode = #tpu.pipeline_mode<synchronous>, transform_indices = @transform_7, window_bounds = array<i64: 64, 128>}, {pipeline_mode = #tpu.pipeline_mode<synchronous>, transform_indices = @transform_8, window_bounds = array<i64: 1, 128>}, {pipeline_mode = #tpu.pipeline_mode<synchronous>, transform_indices = @transform_9, window_bounds = array<i64: 32, 128>}, {pipeline_mode = #tpu.pipeline_mode<synchronous>, transform_indices = @transform_10, window_bounds = array<i64: 48, 128>}, {pipeline_mode = #tpu.pipeline_mode<synchronous>, transform_indices = @transform_11, window_bounds = array<i64: 1, 128>}, {pipeline_mode = #tpu.pipeline_mode<synchronous>, transform_indices = @transform_12, window_bounds = array<i64: 128, 32>}, {pipeline_mode = #tpu.pipeline_mode<synchronous>, transform_indices = @transform_13, window_bounds = array<i64: 1, 32>}, {transform_indices = @transform_14, window_bounds = array<i64: 8, 128>}, {transform_indices = @transform_15, window_bounds = array<i64: 8, 128>}]} {
    %c0 = arith.constant 0 : index
    %c0_0 = arith.constant 0 : index
    %0 = vector.load %arg3[%c0, %c0_0] : memref<8x96xf32, #tpu.memory_space<vmem>>, vector<8x32xf32>
    %c0_1 = arith.constant 0 : index
    %c32 = arith.constant 32 : index
    %1 = vector.load %arg3[%c0_1, %c32] : memref<8x96xf32, #tpu.memory_space<vmem>>, vector<8x32xf32>
    %c0_2 = arith.constant 0 : index
    %c64 = arith.constant 64 : index
    %2 = vector.load %arg3[%c0_2, %c64] : memref<8x96xf32, #tpu.memory_space<vmem>>, vector<8x32xf32>
    %c0_3 = arith.constant 0 : index
    %c0_4 = arith.constant 0 : index
    %3 = vector.load %arg1[%c0_3, %c0_4] : memref<8x64xf32, #tpu.memory_space<vmem>>, vector<8x64xf32>
    %c0_5 = arith.constant 0 : index
    %c0_6 = arith.constant 0 : index
    %4 = vector.load %arg6[%c0_5, %c0_6] : memref<64x128xf32, #tpu.memory_space<vmem>>, vector<64x128xf32>
    %cst = arith.constant dense<0.000000e+00> : vector<8x128xf32>
    %5 = tpu.matmul %3, %4, %cst {dimension_numbers = #tpu.dot_dimension_numbers<[1], [0], [0], [1], [0, 0, 1, 1], [], []>} : vector<8x64xf32>, vector<64x128xf32>, vector<8x128xf32> -> vector<8x128xf32>
    %c0_7 = arith.constant 0 : index
    %c0_8 = arith.constant 0 : index
    %6 = vector.load %arg7[%c0_7, %c0_8] : memref<1x128xf32, #tpu.memory_space<vmem>>, vector<1x128xf32>
    %7 = vector.broadcast %6 : vector<1x128xf32> to vector<8x128xf32>
    %8 = arith.addf %5, %7 : vector<8x128xf32>
    %9 = vector.extract_strided_slice %8 {offsets = [0, 0], sizes = [8, 96], strides = [1, 1]} : vector<8x128xf32> to vector<8x96xf32>
    %10 = arith.negf %9 : vector<8x96xf32>
    %11 = math.exp %10 : vector<8x96xf32>
    %cst_9 = arith.constant 1.000000e+00 : f32
    %12 = vector.broadcast %cst_9 : f32 to vector<8x96xf32>
    %13 = arith.addf %12, %11 : vector<8x96xf32>
    %14 = arith.divf %12, %13 : vector<8x96xf32>
    %15 = vector.extract_strided_slice %8 {offsets = [0, 96], sizes = [8, 32], strides = [1, 1]} : vector<8x128xf32> to vector<8x32xf32>
    %16 = math.tanh %15 : vector<8x32xf32>
    %17 = vector.extract_strided_slice %14 {offsets = [0, 0], sizes = [8, 32], strides = [1, 1]} : vector<8x96xf32> to vector<8x32xf32>
    %18 = vector.extract_strided_slice %14 {offsets = [0, 32], sizes = [8, 32], strides = [1, 1]} : vector<8x96xf32> to vector<8x32xf32>
    %19 = vector.extract_strided_slice %14 {offsets = [0, 64], sizes = [8, 32], strides = [1, 1]} : vector<8x96xf32> to vector<8x32xf32>
    %20 = arith.mulf %18, %1 : vector<8x32xf32>
    %21 = arith.mulf %17, %16 : vector<8x32xf32>
    %22 = arith.addf %20, %21 : vector<8x32xf32>
    %23 = math.tanh %22 : vector<8x32xf32>
    %24 = arith.mulf %19, %23 : vector<8x32xf32>
    %25 = tpu.concatenate %24, %0 in 1 : vector<8x32xf32>, vector<8x32xf32> -> vector<8x64xf32>
    %c0_10 = arith.constant 0 : index
    %c0_11 = arith.constant 0 : index
    %26 = vector.load %arg8[%c0_10, %c0_11] : memref<64x128xf32, #tpu.memory_space<vmem>>, vector<64x128xf32>
    %cst_12 = arith.constant dense<0.000000e+00> : vector<8x128xf32>
    %27 = tpu.matmul %25, %26, %cst_12 {dimension_numbers = #tpu.dot_dimension_numbers<[1], [0], [0], [1], [0, 0, 1, 1], [], []>} : vector<8x64xf32>, vector<64x128xf32>, vector<8x128xf32> -> vector<8x128xf32>
    %c0_13 = arith.constant 0 : index
    %c0_14 = arith.constant 0 : index
    %28 = vector.load %arg9[%c0_13, %c0_14] : memref<1x128xf32, #tpu.memory_space<vmem>>, vector<1x128xf32>
    %29 = vector.broadcast %28 : vector<1x128xf32> to vector<8x128xf32>
    %30 = arith.addf %27, %29 : vector<8x128xf32>
    %31 = vector.extract_strided_slice %30 {offsets = [0, 0], sizes = [8, 96], strides = [1, 1]} : vector<8x128xf32> to vector<8x96xf32>
    %32 = arith.negf %31 : vector<8x96xf32>
    %33 = math.exp %32 : vector<8x96xf32>
    %cst_15 = arith.constant 1.000000e+00 : f32
    %34 = vector.broadcast %cst_15 : f32 to vector<8x96xf32>
    %35 = arith.addf %34, %33 : vector<8x96xf32>
    %36 = arith.divf %34, %35 : vector<8x96xf32>
    %37 = vector.extract_strided_slice %30 {offsets = [0, 96], sizes = [8, 32], strides = [1, 1]} : vector<8x128xf32> to vector<8x32xf32>
    %38 = math.tanh %37 : vector<8x32xf32>
    %39 = vector.extract_strided_slice %36 {offsets = [0, 0], sizes = [8, 32], strides = [1, 1]} : vector<8x96xf32> to vector<8x32xf32>
    %40 = vector.extract_strided_slice %36 {offsets = [0, 32], sizes = [8, 32], strides = [1, 1]} : vector<8x96xf32> to vector<8x32xf32>
    %41 = vector.extract_strided_slice %36 {offsets = [0, 64], sizes = [8, 32], strides = [1, 1]} : vector<8x96xf32> to vector<8x32xf32>
    %42 = arith.mulf %40, %2 : vector<8x32xf32>
    %43 = arith.mulf %39, %38 : vector<8x32xf32>
    %44 = arith.addf %42, %43 : vector<8x32xf32>
    %45 = math.tanh %44 : vector<8x32xf32>
    %46 = arith.mulf %41, %45 : vector<8x32xf32>
    %c0_16 = arith.constant 0 : index
    %c0_17 = arith.constant 0 : index
    %47 = vector.load %arg10[%c0_16, %c0_17] : memref<32x128xf32, #tpu.memory_space<vmem>>, vector<32x128xf32>
    %cst_18 = arith.constant dense<0.000000e+00> : vector<8x128xf32>
    %48 = tpu.matmul %46, %47, %cst_18 {dimension_numbers = #tpu.dot_dimension_numbers<[1], [0], [0], [1], [0, 0, 1, 1], [], []>} : vector<8x32xf32>, vector<32x128xf32>, vector<8x128xf32> -> vector<8x128xf32>
    %c0_19 = arith.constant 0 : index
    %c0_20 = arith.constant 0 : index
    %49 = vector.load %arg2[%c0_19, %c0_20] : memref<8x48xf32, #tpu.memory_space<vmem>>, vector<8x48xf32>
    %c0_21 = arith.constant 0 : index
    %c0_22 = arith.constant 0 : index
    %50 = vector.load %arg11[%c0_21, %c0_22] : memref<48x128xf32, #tpu.memory_space<vmem>>, vector<48x128xf32>
    %cst_23 = arith.constant dense<0.000000e+00> : vector<8x128xf32>
    %51 = tpu.matmul %49, %50, %cst_23 {dimension_numbers = #tpu.dot_dimension_numbers<[1], [0], [0], [1], [0, 0, 1, 1], [], []>} : vector<8x48xf32>, vector<48x128xf32>, vector<8x128xf32> -> vector<8x128xf32>
    %52 = arith.addf %48, %51 : vector<8x128xf32>
    %c0_24 = arith.constant 0 : index
    %c0_25 = arith.constant 0 : index
    %53 = vector.load %arg12[%c0_24, %c0_25] : memref<1x128xf32, #tpu.memory_space<vmem>>, vector<1x128xf32>
    %54 = vector.broadcast %53 : vector<1x128xf32> to vector<8x128xf32>
    %55 = arith.addf %52, %54 : vector<8x128xf32>
    %cst_26 = arith.constant 0.000000e+00 : f32
    %56 = vector.broadcast %cst_26 : f32 to vector<8x128xf32>
    %57 = arith.maximumf %55, %56 : vector<8x128xf32>
    %c0_27 = arith.constant 0 : index
    %c0_28 = arith.constant 0 : index
    %58 = vector.load %arg13[%c0_27, %c0_28] : memref<128x32xf32, #tpu.memory_space<vmem>>, vector<128x32xf32>
    %cst_29 = arith.constant dense<0.000000e+00> : vector<8x32xf32>
    %59 = tpu.matmul %57, %58, %cst_29 {dimension_numbers = #tpu.dot_dimension_numbers<[1], [0], [0], [1], [0, 0, 1, 1], [], []>} : vector<8x128xf32>, vector<128x32xf32>, vector<8x32xf32> -> vector<8x32xf32>
    %c0_30 = arith.constant 0 : index
    %c0_31 = arith.constant 0 : index
    %60 = vector.load %arg14[%c0_30, %c0_31] : memref<1x32xf32, #tpu.memory_space<vmem>>, vector<1x32xf32>
    %61 = vector.broadcast %60 : vector<1x32xf32> to vector<8x32xf32>
    %62 = arith.addf %59, %61 : vector<8x32xf32>
    %cst_32 = arith.constant 0.000000e+00 : f32
    %63 = vector.broadcast %cst_32 : f32 to vector<8x32xf32>
    %64 = arith.maximumf %62, %63 : vector<8x32xf32>
    %c0_33 = arith.constant 0 : index
    %c0_34 = arith.constant 0 : index
    %c0_35 = arith.constant 0 : index
    %65 = vector.load %arg4[%c0_33, %c0_34, %c0_35] : memref<8x32x128xbf16, #tpu.memory_space<vmem>>, vector<8x32x128xbf16>
    %66 = arith.extf %65 : vector<8x32x128xbf16> to vector<8x32x128xf32>
    %67 = vector.shape_cast %64 : vector<8x32xf32> to vector<8x32x1xf32>
    %68 = vector.broadcast %67 : vector<8x32x1xf32> to vector<8x32x128xf32>
    %69 = arith.mulf %66, %68 : vector<8x32x128xf32>
    %cst_36 = arith.constant dense<0.000000e+00> : vector<8x128xf32>
    %70 = vector.multi_reduction <add>, %69, %cst_36 [1] : vector<8x32x128xf32> to vector<8x128xf32>
    %c0_37 = arith.constant 0 : index
    %c0_38 = arith.constant 0 : index
    %71 = vector.load %arg5[%c0_37, %c0_38] : memref<8x128xi32, #tpu.memory_space<vmem>>, vector<8x128xi32>
    %c0_i32 = arith.constant 0 : i32
    %72 = vector.broadcast %c0_i32 : i32 to vector<8x128xi32>
    %73 = arith.cmpi eq, %71, %72 : vector<8x128xi32>
    %cst_39 = arith.constant -9.999900e+04 : f32
    %74 = vector.broadcast %cst_39 : f32 to vector<8x128xf32>
    %75 = arith.select %73, %74, %70 : vector<8x128xi1>, vector<8x128xf32>
    %cst_40 = arith.constant dense<0xFF800000> : vector<8xf32>
    %76 = vector.multi_reduction <maximumf>, %75, %cst_40 [1] : vector<8x128xf32> to vector<8xf32>
    %77 = vector.shape_cast %76 : vector<8xf32> to vector<8x1xf32>
    %78 = vector.broadcast %77 : vector<8x1xf32> to vector<8x128xf32>
    %79 = arith.subf %75, %78 : vector<8x128xf32>
    %80 = math.exp %79 : vector<8x128xf32>
    %cst_41 = arith.constant dense<0.000000e+00> : vector<8xf32>
    %81 = vector.multi_reduction <add>, %80, %cst_41 [1] : vector<8x128xf32> to vector<8xf32>
    %82 = vector.shape_cast %81 : vector<8xf32> to vector<8x1xf32>
    %83 = tpu.reciprocal %82 : vector<8x1xf32> -> vector<8x1xf32>
    %84 = vector.broadcast %83 : vector<8x1xf32> to vector<8x128xf32>
    %85 = arith.mulf %80, %84 : vector<8x128xf32>
    %c0_42 = arith.constant 0 : index
    %c0_43 = arith.constant 0 : index
    %86 = vector.load %arg15[%c0_42, %c0_43] : memref<8x128xf32, #tpu.memory_space<vmem>>, vector<8x128xf32>
    tpu.vector_store %arg15[%c0_42, %c0_43], %85 {strides = array<i32>} : memref<8x128xf32, #tpu.memory_space<vmem>>, vector<8x128xf32>,
    %87 = tpu.concatenate %24, %22, %46, %44 in 1 : vector<8x32xf32>, vector<8x32xf32>, vector<8x32xf32>, vector<8x32xf32> -> vector<8x128xf32>
    %c0_44 = arith.constant 0 : index
    %c0_45 = arith.constant 0 : index
    %88 = vector.load %arg16[%c0_44, %c0_45] : memref<8x128xf32, #tpu.memory_space<vmem>>, vector<8x128xf32>
    tpu.vector_store %arg16[%c0_44, %c0_45], %87 {strides = array<i32>} : memref<8x128xf32, #tpu.memory_space<vmem>>, vector<8x128xf32>,
    return
  }
  func.func @transform_0(%arg0: i32) -> (i32, i32) {
    %c0_i32 = arith.constant 0 : i32
    %c0_i32_0 = arith.constant 0 : i32
    return %arg0, %c0_i32 : i32, i32
  }
  func.func @transform_1(%arg0: i32) -> (i32, i32) {
    %c0_i32 = arith.constant 0 : i32
    %c0_i32_0 = arith.constant 0 : i32
    return %arg0, %c0_i32 : i32, i32
  }
  func.func @transform_2(%arg0: i32) -> (i32, i32) {
    %c0_i32 = arith.constant 0 : i32
    %c0_i32_0 = arith.constant 0 : i32
    return %arg0, %c0_i32 : i32, i32
  }
  func.func @transform_3(%arg0: i32) -> (i32, i32, i32) {
    %c0_i32 = arith.constant 0 : i32
    %c0_i32_0 = arith.constant 0 : i32
    %c0_i32_1 = arith.constant 0 : i32
    return %arg0, %c0_i32, %c0_i32_0 : i32, i32, i32
  }
  func.func @transform_4(%arg0: i32) -> (i32, i32) {
    %c0_i32 = arith.constant 0 : i32
    %c0_i32_0 = arith.constant 0 : i32
    return %arg0, %c0_i32 : i32, i32
  }
  func.func @transform_5(%arg0: i32) -> (i32, i32) {
    %c0_i32 = arith.constant 0 : i32
    %c0_i32_0 = arith.constant 0 : i32
    %c0_i32_1 = arith.constant 0 : i32
    return %c0_i32, %c0_i32_0 : i32, i32
  }
  func.func @transform_6(%arg0: i32) -> (i32, i32) {
    %c0_i32 = arith.constant 0 : i32
    %c0_i32_0 = arith.constant 0 : i32
    %c0_i32_1 = arith.constant 0 : i32
    return %c0_i32, %c0_i32_0 : i32, i32
  }
  func.func @transform_7(%arg0: i32) -> (i32, i32) {
    %c0_i32 = arith.constant 0 : i32
    %c0_i32_0 = arith.constant 0 : i32
    %c0_i32_1 = arith.constant 0 : i32
    return %c0_i32, %c0_i32_0 : i32, i32
  }
  func.func @transform_8(%arg0: i32) -> (i32, i32) {
    %c0_i32 = arith.constant 0 : i32
    %c0_i32_0 = arith.constant 0 : i32
    %c0_i32_1 = arith.constant 0 : i32
    return %c0_i32, %c0_i32_0 : i32, i32
  }
  func.func @transform_9(%arg0: i32) -> (i32, i32) {
    %c0_i32 = arith.constant 0 : i32
    %c0_i32_0 = arith.constant 0 : i32
    %c0_i32_1 = arith.constant 0 : i32
    return %c0_i32, %c0_i32_0 : i32, i32
  }
  func.func @transform_10(%arg0: i32) -> (i32, i32) {
    %c0_i32 = arith.constant 0 : i32
    %c0_i32_0 = arith.constant 0 : i32
    %c0_i32_1 = arith.constant 0 : i32
    return %c0_i32, %c0_i32_0 : i32, i32
  }
  func.func @transform_11(%arg0: i32) -> (i32, i32) {
    %c0_i32 = arith.constant 0 : i32
    %c0_i32_0 = arith.constant 0 : i32
    %c0_i32_1 = arith.constant 0 : i32
    return %c0_i32, %c0_i32_0 : i32, i32
  }
  func.func @transform_12(%arg0: i32) -> (i32, i32) {
    %c0_i32 = arith.constant 0 : i32
    %c0_i32_0 = arith.constant 0 : i32
    %c0_i32_1 = arith.constant 0 : i32
    return %c0_i32, %c0_i32_0 : i32, i32
  }
  func.func @transform_13(%arg0: i32) -> (i32, i32) {
    %c0_i32 = arith.constant 0 : i32
    %c0_i32_0 = arith.constant 0 : i32
    %c0_i32_1 = arith.constant 0 : i32
    return %c0_i32, %c0_i32_0 : i32, i32
  }
  func.func @transform_14(%arg0: i32) -> (i32, i32) {
    %c0_i32 = arith.constant 0 : i32
    %c0_i32_0 = arith.constant 0 : i32
    return %arg0, %c0_i32 : i32, i32
  }
  func.func @transform_15(%arg0: i32) -> (i32, i32) {
    %c0_i32 = arith.constant 0 : i32
    %c0_i32_0 = arith.constant 0 : i32
    return %arg0, %c0_i32 : i32, i32
  }
}

</mosaic_0001>

<bundles_post_ra>
// kernel: tpu_custom_call.1
= control target key start
LH: loop header
LB: loop body
LE: loop exit
PB: predicated region body
PF: predicated region fallthrough
CT: control target
= control target key end

     0   :  { %21 = vsyncpa [#allocation3], 0  ;;  %s2009_s0 = inlined_call_operand.hbm [shape: f32[8,64], index: 0, kind: input, shape index: {}]   ;;  %s2010_s1 = inlined_call_operand.hbm [shape: f32[8,48], index: 1, kind: input, shape index: {}]   ;;  %s2011_s2 = inlined_call_operand.hbm [shape: f32[8,96], index: 2, kind: input, shape index: {}]   ;;  %s2012_s3 = inlined_call_operand.vmem [shape: bf16[8,32,128], index: 3, kind: input, shape index: {}]   ;;  %s2013_s4 = inlined_call_operand.hbm [shape: s32[8,128], index: 4, kind: input, shape index: {}]   ;;  %s2014_s5 = inlined_call_operand.hbm [shape: f32[64,128], index: 5, kind: input, shape index: {}]   ;;  %s2015_s6 = inlined_call_operand.vmem [shape: f32[1,128], index: 6, kind: input, shape index: {}]   ;;  %s2016_s7 = inlined_call_operand.hbm [shape: f32[64,128], index: 7, kind: input, shape index: {}]   ;;  %s2017_s8 = inlined_call_operand.vmem [shape: f32[1,128], index: 8, kind: input, shape index: {}]   ;;  %s2018_s9 = inlined_call_operand.hbm [shape: f32[32,128], index: 9, kind: input, shape index: {}]   ;;  %s2019_s10 = inlined_call_operand.vmem [shape: f32[48,128], index: 10, kind: input, shape index: {}]   ;;  %s2020_s11 = inlined_call_operand.vmem [shape: f32[1,128], index: 11, kind: input, shape index: {}]   ;;  %s2021_s12 = inlined_call_operand.vmem [shape: f32[128,32], index: 12, kind: input, shape index: {}]   ;;  %s2022_s13 = inlined_call_operand.vmem [shape: f32[1,32], index: 13, kind: input, shape index: {}]   ;;  %s2023_s14 = inlined_call_operand.hbm [shape: f32[8,128], index: 14, kind: output, shape index: {0}]   ;;  %s2024_s15 = inlined_call_operand.hbm [shape: f32[8,128], index: 15, kind: output, shape index: {1}]  }
   0x1   :  { %22 = vsyncpa [#allocation6], 0 }
   0x2   :  { %23 = vsyncpa [#allocation9], 0 }
   0x3   :  { %24 = vsyncpa [#allocation12], 0 }
   0x4   :  { %25 = vsyncpa [#allocation4], 0 }
   0x5   :  { %26 = vsyncpa [#allocation16], 0  ;;  %s1583_s18 = smov [#allocation5]   ;;  %s1584_s20 = smov [#allocation8]  }
   0x6   :  { %s43_s19 = sshll.u32 %s1583_s18, 4  ;;  %s65_s21 = sshll.u32 %s1584_s20, 4  ;;  %s44_s19 = int_to_ptr.vmem [resolvable:$true] %s43_s19  ;;  %s66_s21 = int_to_ptr.vmem [resolvable:$true] %s65_s21 }
   0x7   :  { %s1373_s24 = scalar_lea.hbm %s2010_s1, 128 }
   0x8   :  { %p1374_p0 = scmp.ne.s32.totalorder %s2010_s1, %s1373_s24  ;;  %p1377_p1 = scmp.lt.u32.totalorder %s1373_s24, %s2010_s1 }
   0xa   :  { %p1379_p2 = pnand %p1377_p1, %p1374_p0 }
   0xc   :  { %1382 = shalt.err (!%p1379_p2)
}
   0xd   :  { %s1383_s29 = scalar_lea.vmem %s44_s19, 128  ;;  %p1388_p4 = scmp.lt.s32.totalorder %s44_s19, %s44_s19 }
   0xe   :  { %p1384_p3 = scmp.ne.s32.totalorder %s44_s19, %s1383_s29  ;;  %p1389_p5 = scmp.lt.s32.totalorder %s1383_s29, %s1383_s29 }
  0x10   :  { %p1390_p6 = por %p1389_p5, %p1388_p4 }
  0x12   :  { %p1391_p7 = pnand %p1390_p6, %p1384_p3 }
  0x14   :  { %1394 = shalt.err (!%p1391_p7)
}
  0x15   :  { %46 = dma.hbm_to_vmem [thread:$0]  %s2010_s1, 128, %s44_s19, [#allocation6]  }
  0x16   :  { %s1395_s20 = scalar_lea.hbm %s2013_s4, 128 }
  0x17   :  { %p1396_p8 = scmp.ne.s32.totalorder %s2013_s4, %s1395_s20  ;;  %p1399_p9 = scmp.lt.u32.totalorder %s1395_s20, %s2013_s4 }
  0x19   :  { %p1401_p10 = pnand %p1399_p9, %p1396_p8 }
  0x1b   :  { %1404 = shalt.err (!%p1401_p10)
}
  0x1c   :  { %s1405_s26 = scalar_lea.vmem %s66_s21, 128  ;;  %p1410_p12 = scmp.lt.s32.totalorder %s66_s21, %s66_s21 }
  0x1d   :  { %p1406_p11 = scmp.ne.s32.totalorder %s66_s21, %s1405_s26  ;;  %p1411_p13 = scmp.lt.s32.totalorder %s1405_s26, %s1405_s26 }
  0x1f   :  { %p1412_p0 = por %p1411_p13, %p1410_p12 }
  0x21   :  { %p1413_p1 = pnand %p1412_p0, %p1406_p11 }
  0x23   :  { %1416 = shalt.err (!%p1413_p1)
}
  0x24   :  { %68 = dma.hbm_to_vmem [thread:$0]  %s2013_s4, 128, %s66_s21, [#allocation9]  }
  0x25   :  { %s1585_s27 = smov [#allocation11]   ;;  %s1586_s29 = smov [#allocation2]  }
  0x26   :  { %s88_s28 = sshll.u32 %s1585_s27, 4  ;;  %s33_s30 = sshll.u32 %s1586_s29, 4  ;;  %s89_s28 = int_to_ptr.vmem [resolvable:$true] %s88_s28  ;;  %s34_s30 = int_to_ptr.vmem [resolvable:$true] %s33_s30 }
  0x27   :  { %s1417_s18 = scalar_lea.hbm %s2016_s7, 1024 }
  0x28   :  { %p1418_p2 = scmp.ne.s32.totalorder %s2016_s7, %s1417_s18  ;;  %p1421_p3 = scmp.lt.u32.totalorder %s1417_s18, %s2016_s7 }
  0x2a   :  { %p1423_p4 = pnand %p1421_p3, %p1418_p2 }
  0x2c   :  { %1426 = shalt.err (!%p1423_p4)
}
  0x2d   :  { %s1427_s4 = scalar_lea.vmem %s89_s28, 1024  ;;  %p1432_p6 = scmp.lt.s32.totalorder %s89_s28, %s89_s28 }
  0x2e   :  { %p1428_p5 = scmp.ne.s32.totalorder %s89_s28, %s1427_s4  ;;  %p1433_p7 = scmp.lt.s32.totalorder %s1427_s4, %s1427_s4 }
  0x30   :  { %p1434_p8 = por %p1433_p7, %p1432_p6 }
  0x32   :  { %p1435_p9 = pnand %p1434_p8, %p1428_p5 }
  0x34   :  { %1438 = shalt.err (!%p1435_p9)
}
  0x35   :  { %s1587_s21 = smov 128   ;;  %s1588_s25 = smov 8  }
  0x36   :  { %94 = dma.hbm_to_vmem [thread:$0]  %s2016_s7, 1024, %s89_s28, [#allocation12], %s1587_s21, %s1587_s21, %s1588_s25  }
  0x37   :  { %s1439_s29 = scalar_lea.hbm %s2009_s0, 128 }
  0x38   :  { %p1440_p10 = scmp.ne.s32.totalorder %s2009_s0, %s1439_s29  ;;  %p1443_p11 = scmp.lt.u32.totalorder %s1439_s29, %s2009_s0 }
  0x3a   :  { %p1445_p12 = pnand %p1443_p11, %p1440_p10 }
  0x3c   :  { %1448 = shalt.err (!%p1445_p12)
}
  0x3d   :  { %s1449_s22 = scalar_lea.vmem %s34_s30, 128  ;;  %p1454_p0 = scmp.lt.s32.totalorder %s34_s30, %s34_s30 }
  0x3e   :  { %p1450_p13 = scmp.ne.s32.totalorder %s34_s30, %s1449_s22  ;;  %p1455_p1 = scmp.lt.s32.totalorder %s1449_s22, %s1449_s22 }
  0x40   :  { %p1456_p2 = por %p1455_p1, %p1454_p0 }
  0x42   :  { %p1457_p3 = pnand %p1456_p2, %p1450_p13 }
  0x44   :  { %1460 = shalt.err (!%p1457_p3)
}
  0x45   :  { %36 = dma.hbm_to_vmem [thread:$0]  %s2009_s0, 128, %s34_s30, [#allocation3]  }
  0x46   :  { %s1589_s23 = smov [#allocation7]   ;;  %s1590_s4 = smov [#allocation10]  }
  0x47   :  { %s53_s24 = sshll.u32 %s1589_s23, 4  ;;  %s74_s26 = sshll.u32 %s1590_s4, 4  ;;  %s54_s24 = int_to_ptr.vmem [resolvable:$true] %s53_s24  ;;  %s1731_s26 = int_to_ptr.vmem [resolvable:$true] %s74_s26 }
  0x48   :  { %s1461_s27 = scalar_lea.hbm %s2011_s2, 128 }
  0x49   :  { %p1462_p4 = scmp.ne.s32.totalorder %s2011_s2, %s1461_s27  ;;  %p1465_p5 = scmp.lt.u32.totalorder %s1461_s27, %s2011_s2 }
  0x4b   :  { %p1467_p6 = pnand %p1465_p5, %p1462_p4 }
  0x4d   :  { %1470 = shalt.err (!%p1467_p6)
}
  0x4e   :  { %s1471_s0 = scalar_lea.vmem %s54_s24, 128  ;;  %p1476_p8 = scmp.lt.s32.totalorder %s54_s24, %s54_s24 }
  0x4f   :  { %p1472_p7 = scmp.ne.s32.totalorder %s54_s24, %s1471_s0  ;;  %p1477_p9 = scmp.lt.s32.totalorder %s1471_s0, %s1471_s0 }
  0x51   :  { %p1478_p10 = por %p1477_p9, %p1476_p8 }
  0x53   :  { %p1479_p11 = pnand %p1478_p10, %p1472_p7 }
  0x55   :  { %1482 = shalt.err (!%p1479_p11)
}
  0x56   :  { %56 = dma.hbm_to_vmem [thread:$0]  %s2011_s2, 128, %s54_s24, [#allocation6]  }
  0x57   :  { %s1483_s28 = scalar_lea.hbm %s2014_s5, 1024 }
  0x58   :  { %p1484_p12 = scmp.ne.s32.totalorder %s2014_s5, %s1483_s28  ;;  %p1487_p13 = scmp.lt.u32.totalorder %s1483_s28, %s2014_s5 }
  0x5a   :  { %p1489_p0 = pnand %p1487_p13, %p1484_p12 }
  0x5c   :  { %1492 = shalt.err (!%p1489_p0)
}
  0x5d   :  { %s1493_s27 = scalar_lea.vmem %s1731_s26, 1024  ;;  %p1498_p2 = scmp.lt.s32.totalorder %s1731_s26, %s1731_s26 }
  0x5e   :  { %p1494_p1 = scmp.ne.s32.totalorder %s1731_s26, %s1493_s27  ;;  %p1499_p3 = scmp.lt.s32.totalorder %s1493_s27, %s1493_s27 }
  0x60   :  { %p1500_p4 = por %p1499_p3, %p1498_p2 }
  0x62   :  { %p1501_p5 = pnand %p1500_p4, %p1494_p1 }
  0x64   :  { %1504 = shalt.err (!%p1501_p5)
}
  0x65   :  { %80 = dma.hbm_to_vmem [thread:$0]  %s2014_s5, 1024, %s1731_s26, [#allocation9], %s1587_s21, %s1587_s21, %s1588_s25  }
  0x66   :  { %s1591_s29 = smov [#allocation13]   ;;  %s1505_s0 = scalar_lea.hbm %s2018_s9, 512 }
  0x67   :  { %s102_s16 = sshll.u32 %s1591_s29, 4  ;;  %p1506_p6 = scmp.ne.s32.totalorder %s2018_s9, %s1505_s0  ;;  %s103_s16 = int_to_ptr.vmem [resolvable:$true] %s102_s16 }
  0x68   :  { %p1509_p7 = scmp.lt.u32.totalorder %s1505_s0, %s2018_s9 }
  0x6a   :  { %p1511_p8 = pnand %p1509_p7, %p1506_p6 }
  0x6c   :  { %1514 = shalt.err (!%p1511_p8)
}
  0x6d   :  { %s1515_s28 = scalar_lea.vmem %s103_s16, 512  ;;  %p1520_p10 = scmp.lt.s32.totalorder %s103_s16, %s103_s16 }
  0x6e   :  { %p1516_p9 = scmp.ne.s32.totalorder %s103_s16, %s1515_s28  ;;  %p1521_p11 = scmp.lt.s32.totalorder %s1515_s28, %s1515_s28 }
  0x70   :  { %p1522_p12 = por %p1521_p11, %p1520_p10 }
  0x72   :  { %p1523_p13 = pnand %p1522_p12, %p1516_p9 }
  0x74   :  { %1526 = shalt.err (!%p1523_p13)
}
  0x75   :  { %108 = dma.hbm_to_vmem [thread:$0]  %s2018_s9, 512, %s103_s16, [#allocation12], %s1587_s21, %s1587_s21, %s1588_s25  }
  0x76   :  { %1571 = dma.done.wait [#allocation3], 128  }
  0x77   :  { %1572 = vsyncadd [#allocation3], 4294967168 }
  0x78   :  { %1573 = dma.done.wait [#allocation6], 256  }
  0x79   :  { %1574 = vsyncadd [#allocation6], 4294967040 }
  0x7a   :  { %1575 = dma.done.wait [#allocation9], 1152  }
  0x7b   :  { %1576 = vsyncadd [#allocation9], 4294966144 }
  0x7c   :  { %1577 = dma.done.wait [#allocation12], 1536  }
  0x7d   :  { %1578 = vsyncadd [#allocation12], 4294965760  ;;  %v1592_v0 = vmov 0.0|0.0   ;;  %vm1593_vm0 = vmmov 0   ;;  %v1594_v1 = vmov 0.0   ;;  %v140_v2 = vld [vmem:[#allocation10] sm:$0xff] }
  0x7e   :  { %1273 = vmatprep.subr.bf16.mxu0 %v1592_v0  ;;  %1190 = vmatprep.mubr.msk.f32.mxu0 %vm1593_vm0, %v1594_v1  ;;  %v141_v3 = vld [vmem:[#allocation10 + $0x8] sm:$0xff]  ;;  %v142_v4 = vld [vmem:[#allocation10 + $0x10] sm:$0xff]  ;;  %v143_v6 = vld [vmem:[#allocation10 + $0x18] sm:$0xff]  ;;  %vm155_vm1 = vcmask 523264   ;;  %s1595_s25 = smov 32   ;;  %s1597_s23 = smov 64  }
  0x7f   :  { %1306 = vmatprep.subr.bf16.mxu1 %v1592_v0  ;;  %1235 = vmatprep.mubr.msk.f32.mxu1 %vm1593_vm0, %v1594_v1  ;;  %v1274_v5 = vpack.c.bf16 %v141_v3, %v140_v2  ;;  %v1277_v7 = vpack.c.bf16 %v143_v6, %v142_v4  ;;  %v144_v8 = vld [vmem:[#allocation10 + $0x20] sm:$0xff]  ;;  %v145_v9 = vld [vmem:[#allocation10 + $0x28] sm:$0xff]  ;;  %v146_v11 = vld [vmem:[#allocation10 + $0x30] sm:$0xff]  ;;  %vm261_vm2 = vcmask 261120   ;;  %vm389_vm3 = vcmask 392192  }
  0x80   :  { %v1280_v10 = vpack.c.bf16 %v145_v9, %v144_v8  ;;  %v147_v12 = vld [vmem:[#allocation10 + $0x38] sm:$0xff]  ;;  %v139_v14 = vld [vmem:[#allocation2] sm:$0xff]  ;;  %v138_v26 = vld [vmem:[#allocation7] sm:$0xff]  ;;  %vm971_vm4 = vcmask 1041409   ;;  %vm973_vm5 = vcmask 1042434   ;;  %vm975_vm6 = vcmask 1043459  }
  0x81   :  { %1275 = vmatpush3.bf16.msra.mxu0 %v1274_v5  ;;  %v1283_v13 = vpack.c.bf16 %v147_v12, %v146_v11  ;;  %v1038_v15 = vld [vmem:[%s2015_s6] ss:$0 sm:$0xff]  ;;  %v264_v31 = vld [vmem:[#allocation11 + $0x8] sm:$0xff]  ;;  %v265_v32 = vld [vmem:[#allocation11 + $0x10] sm:$0xff]  ;;  %s1596_s6 = smov 96   ;;  %vm977_vm7 = vcmask 1044484  }
  0x82   :  { %1276 = vmatprep.subr.bf16.mxu0 %v1592_v0  ;;  %v263_v30 = vld [vmem:[#allocation11] sm:$0xff]  ;;  %v266_v34 = vld [vmem:[#allocation11 + $0x18] sm:$0xff]  ;;  %v268_v37 = vld [vmem:[#allocation11 + $0x28] sm:$0xff]  ;;  %vm979_vm8 = vcmask 1045509   ;;  %vm981_vm9 = vcmask 1046534   ;;  %vm983_vm10 = vcmask 1047559  }
  0x83   :  { %v1286_v33 = vpack.c.bf16 %v264_v31, %v263_v30  ;;  %v1289_v35 = vpack.c.bf16 %v266_v34, %v265_v32  ;;  %v267_v36 = vld [vmem:[#allocation11 + $0x20] sm:$0xff]  ;;  %v269_v39 = vld [vmem:[#allocation11 + $0x30] sm:$0xff]  ;;  %v270_v40 = vld [vmem:[#allocation11 + $0x38] sm:$0xff]  ;;  %vm1003_vm12 = vcmask 785408  }
  0x84   :  { %v1292_v38 = vpack.c.bf16 %v268_v37, %v267_v36  ;;  %v1295_v42 = vpack.c.bf16 %v270_v40, %v269_v39  ;;  %v1041_v48 = vld [vmem:[%s2017_s8] ss:$0 sm:$0xff]  ;;  %v384_v2 = vld [vmem:[%s2019_s10 + $0x8] sm:$0xff]  ;;  %v385_v3 = vld [vmem:[%s2019_s10 + $0x10] sm:$0xff] }
  0x85   :  { %1278 = vmatpush3.bf16.msra.mxu0 %v1277_v7  ;;  %v383_v63 = vld [vmem:[%s2019_s10] sm:$0xff]  ;;  %v386_v5 = vld [vmem:[%s2019_s10 + $0x18] sm:$0xff]  ;;  %v379_v7 = vld [vmem:[#allocation13 + $0x8] sm:$0xff] }
  0x86   :  { %1279 = vmatprep.subr.bf16.mxu0 %v1592_v0  ;;  %v1298_v4 = vpack.c.bf16 %v384_v2, %v383_v63  ;;  %v378_v6 = vld [vmem:[#allocation13] sm:$0xff]  ;;  %v380_v9 = vld [vmem:[#allocation13 + $0x10] sm:$0xff]  ;;  %v381_v11 = vld [vmem:[#allocation13 + $0x18] sm:$0xff] }
  0x87   :  { %v1307_v8 = vpack.c.bf16 %v379_v7, %v378_v6  ;;  %v387_v12 = vld [vmem:[%s2019_s10 + $0x20] sm:$0xff]  ;;  %v552_v31 = vld [vmem:[%s2021_s12 + $0x28] sm:$0xff]  ;;  %v558_v39 = vld [vmem:[%s2021_s12 + $0x58] sm:$0xff] }
  0x88   :  { %v551_v30 = vld [vmem:[%s2021_s12 + $0x20] sm:$0xff]  ;;  %v556_v36 = vld [vmem:[%s2021_s12 + $0x48] sm:$0xff] }
  0x89   :  { %1281 = vmatpush3.bf16.msra.mxu0 %v1280_v10  ;;  %v1301_v10 = vpack.c.bf16 %v386_v5, %v385_v3  ;;  %1308 = vmatpush3.bf16.msra.mxu1 %v1307_v8  ;;  %v1319_v32 = vpack.c.bf16 %v552_v31, %v551_v30  ;;  %v1049_v31 = vld [vmem:[%s2012_s3] sm:$0xff]  }
  0x8a   :  { %1282 = vmatprep.subr.bf16.mxu0 %v1592_v0  ;;  %1309 = vmatprep.subr.bf16.mxu1 %v1592_v0 }
  0x8d   :  { %1284 = vmatpush3.bf16.msra.mxu0 %v1283_v13  ;;  %v388_v13 = vld [vmem:[%s2019_s10 + $0x28] sm:$0xff] }
  0x8e   :  { %1285 = vmatprep.subr.bf16.mxu0 %v1592_v0 }
  0x90   :  { %1191 = vmatmul.mubr.msk.f32.vlgmr.msra.gmra.mrb[0].mxu0 %vm155_vm1, %v139_v14  ;;  %v1310_v14 = vpack.c.bf16 %v381_v11, %v380_v9 }
  0x91   :  { %1209 = vmatprep.mubr.msk.f32.mxu0 %vm1593_vm0, %v1594_v1  ;;  %1287 = vmatpush3.bf16.msra.mxu0 %v1286_v33  ;;  %v553_v33 = vld [vmem:[%s2021_s12 + $0x30] sm:$0xff] }
  0x92   :  { %1288 = vmatprep.subr.bf16.mxu0 %v1592_v0  ;;  %1311 = vmatpush3.bf16.msra.mxu1 %v1310_v14 }
  0x93   :  { %1312 = vmatprep.subr.bf16.mxu1 %v1592_v0 }
  0x95   :  { %1290 = vmatpush3.bf16.msra.mxu0 %v1289_v35  ;;  %v555_v35 = vld [vmem:[%s2021_s12 + $0x40] sm:$0xff] }
  0x96   :  { %1291 = vmatprep.subr.bf16.mxu0 %v1592_v0  ;;  %v1325_v37 = vpack.c.bf16 %v556_v36, %v555_v35  ;;  %v1114_v35 = vld [vmem:[%s2012_s3 + $0x18] sm:$0xff]   ;;  %v1112_v36 = vld [vmem:[%s2012_s3 + $0x8] sm:$0xff]  }
  0x99   :  { %1293 = vmatpush3.bf16.msra.mxu0 %v1292_v38  ;;  %v557_v38 = vld [vmem:[%s2021_s12 + $0x50] sm:$0xff] }
  0x9a   :  { %1294 = vmatprep.subr.bf16.mxu0 %v1592_v0  ;;  %v1328_v40 = vpack.c.bf16 %v558_v39, %v557_v38  ;;  %v1050_v38 = vunpack.c.l.bf16 %v1049_v31 }
  0x9d   :  { %1296 = vmatpush3.bf16.msra.mxu0 %v1295_v42  ;;  %v560_v42 = vld [vmem:[%s2021_s12 + $0x68] sm:$0xff] }
  0x9e   :  { %1297 = vmatprep.subr.bf16.mxu0 %v1592_v0 }
 0x163   :  { %v225_v16 = vpop.f32.mrb[0].mxu0 }
 0x164   :  { %v226_v17 = vadd.f32 %v1038_v15, %v225_v16  ;;  %v1192_v18 = vpop.f32.mrb[1].mxu0  ;;  %v1304_v15 = vpack.c.bf16 %v388_v13, %v387_v12 }
 0x166   :  { %1353 = vtanh.f32 %v226_v17  ;;  %v1040_v20 = vmul.f32 -1.442695, %v226_v17  ;;  %v382_v17 = vld [vmem:[#allocation5] sm:$0xff] }
 0x168   :  { %1355 = vpow2.f32 %v1040_v20 }
 0x170   :  { %v1354_v19 = vpop.eup %1353 }
 0x171   :  { %238 = vrot.lane.b32.xlu0 %v1354_v19, %s1595_s25 }
 0x172   :  { %v1356_v21 = vpop.eup %1355 }
 0x173   :  { %v232_v22 = vadd.f32 1.0, %v1356_v21 }
 0x175   :  { %1357 = vrcp.f32 %v232_v22  ;;  %v547_v22 = vld [vmem:[%s2021_s12] sm:$0xff] }
 0x17f   :  { %v1358_v23 = vpop.eup %1357 }
 0x180   :  { %v236_v27 = vmul.f32 %v1358_v23, %v138_v26 }
 0x1e3   :  { %v239_v24 = vpop.permute.xlu0 %238 }
 0x1e4   :  { %v241_v25 = vmul.f32 %v1358_v23, %v239_v24 }
 0x1e6   :  { %243 = vrot.lane.b32.xlu0 %v241_v25, %s1595_s25  ;;  %v549_v25 = vld [vmem:[%s2021_s12 + $0x10] sm:$0xff] }
 0x1ea   :  { %258 = vrot.lane.b32.xlu0 %v138_v26, %s1595_s25 }
 0x1ee   :  { %358 = vrot.lane.b32.xlu0 %v138_v26, %s1596_s6  ;;  %v550_v26 = vld [vmem:[%s2021_s12 + $0x18] sm:$0xff] }
 0x258   :  { %v244_v28 = vpop.permute.xlu0 %243 }
 0x259   :  { %v1799_v29 = vadd.f32 %v244_v28, %v236_v27  ;;  %v1316_v28 = vpack.c.bf16 %v550_v26, %v549_v25 }
 0x25b   :  { %1359 = vtanh.f32 %v1799_v29 }
 0x25c   :  { %v259_v45 = vpop.permute.xlu0 %258 }
 0x260   :  { %v359_v59 = vpop.permute.xlu0 %358 }
 0x265   :  { %v1360_v41 = vpop.eup %1359 }
 0x266   :  { %249 = vrot.lane.b32.xlu1 %v1360_v41, %s1595_s25  ;;  %v559_v41 = vld [vmem:[%s2021_s12 + $0x60] sm:$0xff] }
 0x2d8   :  { %v250_v43 = vpop.permute.xlu1 %249 }
 0x2d9   :  { %v252_v44 = vmul.f32 %v1358_v23, %v250_v43  ;;  %v548_v23 = vld [vmem:[%s2021_s12 + $0x8] sm:$0xff]  ;;  %v1331_v43 = vpack.c.bf16 %v560_v42, %v559_v41  ;;  %v1117_v41 = vld [vmem:[%s2012_s3 + $0x30] sm:$0xff]  }
 0x2da   :  { %v1313_v24 = vpack.c.bf16 %v548_v23, %v547_v22  ;;  %v1116_v42 = vld [vmem:[%s2012_s3 + $0x28] sm:$0xff]  }
 0x2db   :  { %254 = vrot.lane.b32.xlu1 %v252_v44, %s1597_s23  ;;  %v561_v44 = vld [vmem:[%s2021_s12 + $0x70] sm:$0xff] }
 0x34d   :  { %v1808_v46 = vpop.permute.xlu1 %254 }
 0x34e   :  { %v262_v47 = vsel %vm261_vm2, %v1808_v46, %v259_v45  ;;  %v562_v45 = vld [vmem:[%s2021_s12 + $0x78] sm:$0xff] }
 0x34f   :  { %1210 = vmatmul.mubr.msk.f32.vlgmr.msra.gmra.mrb[2].mxu0 %vm155_vm1, %v262_v47  ;;  %v1334_v47 = vpack.c.bf16 %v562_v45, %v561_v44 }
 0x350   :  { %1224 = vmatprep.mubr.msk.f32.mxu0 %vm1593_vm0, %v1594_v1  ;;  %1299 = vmatpush3.bf16.msra.mxu0 %v1298_v4 }
 0x351   :  { %1300 = vmatprep.subr.bf16.mxu0 %v1592_v0 }
 0x354   :  { %1302 = vmatpush3.bf16.msra.mxu0 %v1301_v10 }
 0x355   :  { %1303 = vmatprep.subr.bf16.mxu0 %v1592_v0 }
 0x358   :  { %1305 = vmatpush3.bf16.msra.mxu0 %v1304_v15 }
 0x35b   :  { %1225 = vmatmul.mubr.msk.f32.vlgmr.msra.gmra.mrb[4].mxu0 %vm389_vm3, %v382_v17 }
 0x422   :  { %v347_v49 = vpop.f32.mrb[2].mxu0 }
 0x423   :  { %v348_v50 = vadd.f32 %v1041_v48, %v347_v49  ;;  %v1211_v51 = vpop.f32.mrb[3].mxu0  ;;  %v1046_v49 = vld [vmem:[%s2020_s11] ss:$0 sm:$0xff] }
 0x425   :  { %1361 = vtanh.f32 %v348_v50  ;;  %v1043_v53 = vmul.f32 -1.442695, %v348_v50 }
 0x427   :  { %1363 = vpow2.f32 %v1043_v53 }
 0x42e   :  { %v459_v20 = vpop.f32.mrb[4].mxu0 }
 0x42f   :  { %v1362_v52 = vpop.eup %1361  ;;  %v1226_v21 = vpop.f32.mrb[5].mxu0 }
 0x430   :  { %363 = vrot.lane.b32.xlu1 %v1362_v52, %s1595_s25 }
 0x431   :  { %v1364_v54 = vpop.eup %1363 }
 0x432   :  { %v354_v55 = vadd.f32 1.0, %v1364_v54 }
 0x434   :  { %1365 = vrcp.f32 %v354_v55  ;;  %v1047_v55 = vld [vmem:[%s2022_s13] ss:$0 sm:$0xff] }
 0x43e   :  { %v1366_v56 = vpop.eup %1365 }
 0x43f   :  { %v361_v60 = vmul.f32 %v1366_v56, %v359_v59 }
 0x4a2   :  { %v364_v57 = vpop.permute.xlu1 %363 }
 0x4a3   :  { %v366_v58 = vmul.f32 %v1366_v56, %v364_v57 }
 0x4a5   :  { %368 = vrot.lane.b32.xlu1 %v366_v58, %s1595_s25 }
 0x517   :  { %v369_v61 = vpop.permute.xlu1 %368 }
 0x518   :  { %v1820_v62 = vadd.f32 %v369_v61, %v361_v60 }
 0x51a   :  { %1367 = vtanh.f32 %v1820_v62 }
 0x524   :  { %v1368_v16 = vpop.eup %1367 }
 0x525   :  { %374 = vrot.lane.b32.xlu0 %v1368_v16, %s1595_s25 }
 0x597   :  { %v375_v18 = vpop.permute.xlu0 %374 }
 0x598   :  { %v1846_v19 = vmul.f32 %v1366_v56, %v375_v18 }
 0x59a   :  { %464 = vrot.lane.b32.xlu1 %v1846_v19, %s1597_s23 }
 0x60c   :  { %v465_v27 = vpop.permute.xlu1 %464 }
 0x60d   :  { %1236 = vmatmul.mubr.msk.f32.vlgmr.msra.gmra.mrb[0].mxu1 %vm261_vm2, %v465_v27 }
 0x60e   :  { %1314 = vmatpush3.bf16.msra.mxu1 %v1313_v24  ;;  %1270 = vmatprep.mubr.msk.f32.mxu1 %vm1593_vm0, %v1594_v1  ;;  %v554_v1 = vld [vmem:[%s2021_s12 + $0x38] sm:$0xff] }
 0x60f   :  { %1315 = vmatprep.subr.bf16.mxu1 %v1592_v0  ;;  %v1322_v34 = vpack.c.bf16 %v554_v1, %v553_v33 }
 0x612   :  { %1317 = vmatpush3.bf16.msra.mxu1 %v1316_v28 }
 0x613   :  { %1318 = vmatprep.subr.bf16.mxu1 %v1592_v0 }
 0x616   :  { %1320 = vmatpush3.bf16.msra.mxu1 %v1319_v32  ;;  %v1113_v32 = vld [vmem:[%s2012_s3 + $0x10] sm:$0xff]  }
 0x617   :  { %1321 = vmatprep.subr.bf16.mxu1 %v1592_v0  ;;  %v1059_v39 = vunpack.c.h.bf16 %v1113_v32 }
 0x61a   :  { %1323 = vmatpush3.bf16.msra.mxu1 %v1322_v34  ;;  %v1115_v34 = vld [vmem:[%s2012_s3 + $0x20] sm:$0xff]  }
 0x61b   :  { %1324 = vmatprep.subr.bf16.mxu1 %v1592_v0  ;;  %v1066_v44 = vunpack.c.l.bf16 %v1115_v34 }
 0x61e   :  { %1326 = vmatpush3.bf16.msra.mxu1 %v1325_v37  ;;  %v1051_v37 = vunpack.c.h.bf16 %v1049_v31 }
 0x61f   :  { %1327 = vmatprep.subr.bf16.mxu1 %v1592_v0 }
 0x622   :  { %1329 = vmatpush3.bf16.msra.mxu1 %v1328_v40  ;;  %v1058_v40 = vunpack.c.l.bf16 %v1113_v32 }
 0x623   :  { %1330 = vmatprep.subr.bf16.mxu1 %v1592_v0 }
 0x626   :  { %1332 = vmatpush3.bf16.msra.mxu1 %v1331_v43  ;;  %v1067_v43 = vunpack.c.h.bf16 %v1115_v34 }
 0x627   :  { %1333 = vmatprep.subr.bf16.mxu1 %v1592_v0  ;;  %v705_v0 = vlaneseq }
 0x629   :  { %v706_v54 = vshrl.u32 %v705_v0, 7  ;;  %v1118_v0 = vld [vmem:[%s2012_s3 + $0x38] sm:$0xff]  }
 0x62a   :  { %1335 = vmatpush3.bf16.msra.mxu1 %v1334_v47 }
 0x62b   :  { %v707_v59 = vsub.s32 0, %v706_v54  ;;  %v726_v63 = vsub.s32 1, %v706_v54  ;;  %v745_v3 = vsub.s32 2, %v706_v54  ;;  %v764_v5 = vsub.s32 3, %v706_v54 }
 0x62c   :  { %v783_v7 = vsub.s32 4, %v706_v54  ;;  %v802_v9 = vsub.s32 5, %v706_v54  ;;  %v821_v11 = vsub.s32 6, %v706_v54  ;;  %v840_v13 = vsub.s32 7, %v706_v54 }
 0x6e0   :  { %v534_v48 = vpop.f32.mrb[0].mxu1 }
 0x6e1   :  { %v535_v50 = vadd.f32 %v534_v48, %v459_v20  ;;  %v1237_v51 = vpop.f32.mrb[1].mxu1  ;;  %v1062_v48 = vunpack.c.l.bf16 %v1114_v35 }
 0x6e2   :  { %v1074_v51 = vunpack.c.l.bf16 %v1117_v41 }
 0x6e3   :  { %v545_v52 = vadd.f32 %v1046_v49, %v535_v50  ;;  %v1054_v49 = vunpack.c.l.bf16 %v1112_v36  ;;  %v1075_v50 = vunpack.c.h.bf16 %v1117_v41  ;;  %v1122_v41 = vld [vmem:[%s2012_s3 + $0x58] sm:$0xff]  }
 0x6e5   :  { %v546_v53 = vmax.f32 %v545_v52, 0.0  ;;  %v1070_v52 = vunpack.c.l.bf16 %v1116_v42 }
 0x6e7   :  { %1271 = vmatmul.mubr.f32.vlgmr.msra.gmra.mrb[2].mxu1 %v546_v53  ;;  %v1055_v53 = vunpack.c.h.bf16 %v1112_v36 }
 0x7ba   :  { %v636_v56 = vpop.f32.mrb[2].mxu1 }
 0x7bb   :  { %v637_v57 = vadd.f32 %v1047_v55, %v636_v56  ;;  %v1272_v58 = vpop.f32.mrb[3].mxu1 }
 0x7bd   :  { %v640_v60 = vmax.f32 %v637_v57, 0.0 }
 0x7bf   :  { %v708_v61 = vrot.slane %v640_v60, %v707_v59  ;;  %v727_v2 = vrot.slane %v640_v60, %v726_v63  ;;  %v746_v4 = vrot.slane %v640_v60, %v745_v3  ;;  %v765_v6 = vrot.slane %v640_v60, %v764_v5 }
 0x7c0   :  { %v784_v8 = vrot.slane %v640_v60, %v783_v7  ;;  %v803_v10 = vrot.slane %v640_v60, %v802_v9  ;;  %v822_v12 = vrot.slane %v640_v60, %v821_v11  ;;  %v841_v14 = vrot.slane %v640_v60, %v840_v13 }
 0x7c1   :  { %714 = vbcast.lane.b32.xlu1 %v708_v61, 264  ;;  %710 = vbcast.lane.b32.xlu0 %v708_v61, 256  ;;  %v1063_v60 = vunpack.c.h.bf16 %v1114_v35  ;;  %v1071_v63 = vunpack.c.h.bf16 %v1116_v42  ;;  %v1078_v3 = vunpack.c.l.bf16 %v1118_v0 }
 0x7c5   :  { %733 = vbcast.lane.b32.xlu1 %v727_v2, 264  ;;  %729 = vbcast.lane.b32.xlu0 %v727_v2, 256 }
 0x7c9   :  { %752 = vbcast.lane.b32.xlu1 %v746_v4, 264  ;;  %748 = vbcast.lane.b32.xlu0 %v746_v4, 256 }
 0x7cd   :  { %737 = vbcast.lane.b32.xlu1 %v727_v2, 272  ;;  %718 = vbcast.lane.b32.xlu0 %v708_v61, 272 }
 0x7d1   :  { %771 = vbcast.lane.b32.xlu1 %v765_v6, 264  ;;  %767 = vbcast.lane.b32.xlu0 %v765_v6, 256 }
 0x7d5   :  { %786 = vbcast.lane.b32.xlu1 %v784_v8, 256  ;;  %756 = vbcast.lane.b32.xlu0 %v746_v4, 272 }
 0x7d9   :  { %722 = vbcast.lane.b32.xlu1 %v708_v61, 280  ;;  %790 = vbcast.lane.b32.xlu0 %v784_v8, 264 }
 0x7dd   :  { %775 = vbcast.lane.b32.xlu1 %v765_v6, 272  ;;  %741 = vbcast.lane.b32.xlu0 %v727_v2, 280 }
 0x7e1   :  { %809 = vbcast.lane.b32.xlu1 %v803_v10, 264  ;;  %805 = vbcast.lane.b32.xlu0 %v803_v10, 256 }
 0x7e5   :  { %794 = vbcast.lane.b32.xlu1 %v784_v8, 272  ;;  %760 = vbcast.lane.b32.xlu0 %v746_v4, 280 }
 0x7e9   :  { %828 = vbcast.lane.b32.xlu1 %v822_v12, 264  ;;  %824 = vbcast.lane.b32.xlu0 %v822_v12, 256 }
 0x7ed   :  { %813 = vbcast.lane.b32.xlu1 %v803_v10, 272  ;;  %779 = vbcast.lane.b32.xlu0 %v765_v6, 280 }
 0x7f1   :  { %847 = vbcast.lane.b32.xlu1 %v841_v14, 264  ;;  %843 = vbcast.lane.b32.xlu0 %v841_v14, 256 }
 0x7f5   :  { %832 = vbcast.lane.b32.xlu1 %v822_v12, 272  ;;  %798 = vbcast.lane.b32.xlu0 %v784_v8, 280 }
 0x7f9   :  { %851 = vbcast.lane.b32.xlu1 %v841_v14, 272  ;;  %817 = vbcast.lane.b32.xlu0 %v803_v10, 280 }
 0x7fd   :  { %855 = vbcast.lane.b32.xlu1 %v841_v14, 280  ;;  %836 = vbcast.lane.b32.xlu0 %v822_v12, 280 }
 0x833   :  { %v715_v15 = vpop.permute.xlu1 %714  ;;  %v711_v16 = vpop.permute.xlu0 %710 }
 0x834   :  { %v858_v54 = vmul.f32 %v1051_v37, %v715_v15  ;;  %v857_v55 = vmul.f32 %v1050_v38, %v711_v16 }
 0x836   :  { %v889_v7 = vadd.f32 %v858_v54, %v857_v55 }
 0x837   :  { %v734_v17 = vpop.permute.xlu1 %733  ;;  %v730_v18 = vpop.permute.xlu0 %729 }
 0x838   :  { %v862_v56 = vmul.f32 %v1059_v39, %v734_v17  ;;  %v861_v57 = vmul.f32 %v1058_v40, %v730_v18  ;;  %v1079_v18 = vunpack.c.h.bf16 %v1118_v0 }
 0x83a   :  { %v898_v8 = vadd.f32 %v862_v56, %v861_v57 }
 0x83b   :  { %v753_v20 = vpop.permute.xlu1 %752  ;;  %v749_v21 = vpop.permute.xlu0 %748 }
 0x83c   :  { %v866_v58 = vmul.f32 %v1067_v43, %v753_v20  ;;  %v865_v59 = vmul.f32 %v1066_v44, %v749_v21 }
 0x83e   :  { %v907_v11 = vadd.f32 %v866_v58, %v865_v59  ;;  %v1094_v58 = vunpack.c.l.bf16 %v1122_v41 }
 0x83f   :  { %v738_v22 = vpop.permute.xlu1 %737  ;;  %v719_v23 = vpop.permute.xlu0 %718 }
 0x840   :  { %v863_v4 = vmul.f32 %v1062_v48, %v738_v22  ;;  %v859_v5 = vmul.f32 %v1054_v49, %v719_v23  ;;  %v1119_v22 = vld [vmem:[%s2012_s3 + $0x40] sm:$0xff]   ;;  %v1125_v49 = vld [vmem:[%s2012_s3 + $0x70] sm:$0xff]  }
 0x841   :  { %v1082_v36 = vunpack.c.l.bf16 %v1119_v22 }
 0x842   :  { %v899_v20 = vadd.f32 %v898_v8, %v863_v4  ;;  %v890_v21 = vadd.f32 %v889_v7, %v859_v5 }
 0x843   :  { %v772_v24 = vpop.permute.xlu1 %771  ;;  %v768_v25 = vpop.permute.xlu0 %767 }
 0x844   :  { %v870_v9 = vmul.f32 %v1075_v50, %v772_v24  ;;  %v869_v10 = vmul.f32 %v1074_v51, %v768_v25  ;;  %v1120_v24 = vld [vmem:[%s2012_s3 + $0x48] sm:$0xff]  }
 0x845   :  { %v1086_v38 = vunpack.c.l.bf16 %v1120_v24  ;;  %v1968_v50 = vld [vmem:[%s2012_s3 + $0x68] sm:$0xff]   ;;  %v1087_v59 = vunpack.c.h.bf16 %v1120_v24 }
 0x846   :  { %v916_v25 = vadd.f32 %v870_v9, %v869_v10 }
 0x847   :  { %v1914_v26 = vpop.permute.xlu1 %786  ;;  %v757_v27 = vpop.permute.xlu0 %756 }
 0x848   :  { %v867_v6 = vmul.f32 %v1070_v52, %v757_v27  ;;  %v1083_v27 = vunpack.c.h.bf16 %v1119_v22  ;;  %v873_v56 = vmul.f32 %v1082_v36, %v1914_v26  ;;  %v1095_v26 = vunpack.c.h.bf16 %v1122_v41 }
 0x84a   :  { %v908_v23 = vadd.f32 %v907_v11, %v867_v6 }
 0x84b   :  { %v723_v28 = vpop.permute.xlu1 %722  ;;  %v1916_v30 = vpop.permute.xlu0 %790 }
 0x84c   :  { %v860_v12 = vmul.f32 %v1055_v53, %v723_v28  ;;  %v1121_v28 = vld [vmem:[%s2012_s3 + $0x50] sm:$0xff]   ;;  %v874_v42 = vmul.f32 %v1083_v27, %v1916_v30  ;;  %v1126_v30 = vld [vmem:[%s2012_s3 + $0x78] sm:$0xff]  }
 0x84d   :  { %v1091_v40 = vunpack.c.h.bf16 %v1121_v28  ;;  %v1090_v43 = vunpack.c.l.bf16 %v1121_v28  ;;  %v1110_v7 = vunpack.c.l.bf16 %v1126_v30 }
 0x84e   :  { %v891_v31 = vadd.f32 %v890_v21, %v860_v12  ;;  %v925_v4 = vadd.f32 %v874_v42, %v873_v56 }
 0x84f   :  { %v776_v33 = vpop.permute.xlu1 %775  ;;  %v742_v1 = vpop.permute.xlu0 %741 }
 0x850   :  { %v864_v13 = vmul.f32 %v1063_v60, %v742_v1  ;;  %v871_v17 = vmul.f32 %v1078_v3, %v776_v33  ;;  %v1123_v1 = vld [vmem:[%s2012_s3 + $0x60] sm:$0xff]   ;;  %v892_v51 = vrot.slane %v891_v31, 4  ;;  %v1102_v3 = vunpack.c.l.bf16 %v1968_v50  ;;  %s1598_s3 = smov [#allocation15]  }
 0x851   :  { %v1099_v44 = vunpack.c.h.bf16 %v1123_v1  ;;  %v1098_v0 = vunpack.c.l.bf16 %v1123_v1  ;;  %s1022_s27 = sshll.u32 %s1598_s3, 4  ;;  %s1023_s27 = int_to_ptr.vmem [resolvable:$true] %s1022_s27 }
 0x852   :  { %v900_v32 = vadd.f32 %v899_v20, %v864_v13  ;;  %v917_v37 = vadd.f32 %v916_v25, %v871_v17  ;;  %v893_v8 = vadd.f32 %v892_v51, %v891_v31  ;;  %p1532_p1 = scmp.lt.s32.totalorder %s1023_s27, %s1023_s27 }
 0x853   :  { %v1939_v45 = vpop.permute.xlu1 %809  ;;  %v1941_v47 = vpop.permute.xlu0 %805 }
 0x854   :  { %v901_v52 = vrot.slane %v900_v32, 4  ;;  %v878_v5 = vmul.f32 %v1091_v40, %v1939_v45  ;;  %v877_v6 = vmul.f32 %v1090_v43, %v1941_v47  ;;  %v1111_v45 = vunpack.c.h.bf16 %v1126_v30 }
 0x856   :  { %v902_v9 = vadd.f32 %v901_v52, %v900_v32  ;;  %v1103_v32 = vunpack.c.h.bf16 %v1968_v50 }
 0x857   :  { %v795_v61 = vpop.permute.xlu1 %794  ;;  %v761_v2 = vpop.permute.xlu0 %760 }
 0x858   :  { %v868_v14 = vmul.f32 %v1071_v63, %v761_v2  ;;  %v875_v57 = vmul.f32 %v1086_v38, %v795_v61  ;;  %v1107_v63 = vunpack.c.h.bf16 %v1125_v49  ;;  %v1106_v2 = vunpack.c.l.bf16 %v1125_v49 }
 0x859   :  { %v903_v25 = vrot.slane %v902_v9, 2 }
 0x85a   :  { %v909_v33 = vadd.f32 %v908_v23, %v868_v14  ;;  %v926_v61 = vadd.f32 %v925_v4, %v875_v57  ;;  %v934_v23 = vadd.f32 %v878_v5, %v877_v6 }
 0x85b   :  { %v829_v15 = vpop.permute.xlu1 %828  ;;  %v825_v16 = vpop.permute.xlu0 %824  ;;  %v904_v40 = vadd.f32 %v903_v25, %v902_v9 }
 0x85c   :  { %v910_v53 = vrot.slane %v909_v33, 4  ;;  %v882_v13 = vmul.f32 %v1099_v44, %v829_v15 }
 0x85d   :  { %v905_v57 = vrot.slane %v904_v40, 1 }
 0x85e   :  { %v911_v10 = vadd.f32 %v910_v53, %v909_v33 }
 0x85f   :  { %v814_v34 = vpop.permute.xlu1 %813  ;;  %v780_v35 = vpop.permute.xlu0 %779  ;;  %v906_v9 = vadd.f32 %v905_v57, %v904_v40 }
 0x860   :  { %v872_v39 = vmul.f32 %v1079_v18, %v780_v35  ;;  %v879_v14 = vmul.f32 %v1094_v58, %v814_v34  ;;  %v881_v18 = vmul.f32 %v1098_v0, %v825_v16  ;;  %v912_v47 = vrot.slane %v911_v10, 2 }
 0x861   :  { %v894_v34 = vrot.slane %v893_v8, 2 }
 0x862   :  { %v918_v48 = vadd.f32 %v917_v37, %v872_v39  ;;  %v935_v33 = vadd.f32 %v934_v23, %v879_v14  ;;  %v943_v36 = vadd.f32 %v882_v13, %v881_v18  ;;  %v913_v41 = vadd.f32 %v912_v47, %v911_v10  ;;  %v961_v23 = vld [vmem:[#allocation8] sm:$0xff] }
 0x863   :  { %v848_v54 = vpop.permute.xlu1 %847  ;;  %v844_v55 = vpop.permute.xlu0 %843  ;;  %v895_v53 = vadd.f32 %v894_v34, %v893_v8  ;;  %vm962_vm11 = vcmp.eq.s32.totalorder %v961_v23, 0 }
 0x864   :  { %v919_v60 = vrot.slane %v918_v48, 4  ;;  %v886_v21 = vmul.f32 %v1107_v63, %v848_v54  ;;  %v885_v22 = vmul.f32 %v1106_v2, %v844_v55  ;;  %v914_v58 = vrot.slane %v913_v41, 1 }
 0x865   :  { %v896_v2 = vrot.slane %v895_v53, 1 }
 0x866   :  { %v920_v20 = vadd.f32 %v919_v60, %v918_v48  ;;  %v952_v37 = vadd.f32 %v886_v21, %v885_v22  ;;  %v915_v10 = vadd.f32 %v914_v58, %v913_v41 }
 0x867   :  { %v833_v11 = vpop.permute.xlu1 %832  ;;  %v799_v12 = vpop.permute.xlu0 %798 }
 0x868   :  { %v876_v17 = vmul.f32 %v1087_v59, %v799_v12  ;;  %v883_v27 = vmul.f32 %v1102_v3, %v833_v11  ;;  %v921_v16 = vrot.slane %v920_v20, 2 }
 0x86a   :  { %v927_v24 = vadd.f32 %v926_v61, %v876_v17  ;;  %v944_v42 = vadd.f32 %v943_v36, %v883_v27  ;;  %v922_v0 = vadd.f32 %v921_v16, %v920_v20 }
 0x86b   :  { %v852_v28 = vpop.permute.xlu1 %851  ;;  %v818_v31 = vpop.permute.xlu0 %817 }
 0x86c   :  { %v928_v1 = vrot.slane %v927_v24, 4  ;;  %v887_v35 = vmul.f32 %v1110_v7, %v852_v28  ;;  %v880_v15 = vmul.f32 %v1095_v26, %v818_v31  ;;  %v923_v3 = vrot.slane %v922_v0, 1 }
 0x86d   :  { %v897_v26 = vadd.f32 %v896_v2, %v895_v53 }
 0x86e   :  { %v929_v38 = vadd.f32 %v928_v1, %v927_v24  ;;  %v936_v39 = vadd.f32 %v935_v33, %v880_v15  ;;  %v953_v43 = vadd.f32 %v952_v37, %v887_v35  ;;  %v924_v61 = vadd.f32 %v923_v3, %v922_v0 }
 0x86f   :  { %v856_v44 = vpop.permute.xlu1 %855  ;;  %v837_v48 = vpop.permute.xlu0 %836  ;;  %v972_v18 = vsel %vm971_vm4, %v906_v9, %v897_v26  ;;  %v1001_v15 = vsel %vm261_vm2, %v1808_v46, %v1799_v29 }
 0x870   :  { %v930_v49 = vrot.slane %v929_v38, 2  ;;  %v937_v51 = vrot.slane %v936_v39, 4  ;;  %v888_v52 = vmul.f32 %v1111_v45, %v856_v44  ;;  %v884_v50 = vmul.f32 %v1103_v32, %v837_v48 }
 0x871   :  { %v974_v24 = vsel %vm973_vm5, %v915_v10, %v972_v18  ;;  %v1002_v36 = vsel %vm155_vm1, %v1001_v15, %v1846_v19 }
 0x872   :  { %v931_v54 = vadd.f32 %v930_v49, %v929_v38  ;;  %v938_v55 = vadd.f32 %v937_v51, %v936_v39  ;;  %v954_v30 = vadd.f32 %v953_v43, %v888_v52  ;;  %v945_v56 = vadd.f32 %v944_v42, %v884_v50 }
 0x873   :  { %v976_v45 = vsel %vm975_vm6, %v924_v61, %v974_v24 }
 0x874   :  { %v939_v59 = vrot.slane %v938_v55, 2  ;;  %v955_v60 = vrot.slane %v954_v30, 4  ;;  %v946_v63 = vrot.slane %v945_v56, 4  ;;  %v932_v4 = vrot.slane %v931_v54, 1 }
 0x876   :  { %v940_v5 = vadd.f32 %v939_v59, %v938_v55  ;;  %v956_v6 = vadd.f32 %v955_v60, %v954_v30  ;;  %v947_v7 = vadd.f32 %v946_v63, %v945_v56  ;;  %v933_v13 = vadd.f32 %v932_v4, %v931_v54 }
 0x878   :  { %v941_v8 = vrot.slane %v940_v5, 1  ;;  %v957_v11 = vrot.slane %v956_v6, 2  ;;  %v948_v12 = vrot.slane %v947_v7, 2  ;;  %v978_v27 = vsel %vm977_vm7, %v933_v13, %v976_v45 }
 0x87a   :  { %v958_v14 = vadd.f32 %v957_v11, %v956_v6  ;;  %v949_v17 = vadd.f32 %v948_v12, %v947_v7  ;;  %v942_v20 = vadd.f32 %v941_v8, %v940_v5 }
 0x87c   :  { %v950_v21 = vrot.slane %v949_v17, 1  ;;  %v959_v22 = vrot.slane %v958_v14, 1  ;;  %v980_v28 = vsel %vm979_vm8, %v942_v20, %v978_v27 }
 0x87e   :  { %v951_v25 = vadd.f32 %v950_v21, %v949_v17  ;;  %v960_v47 = vadd.f32 %v959_v22, %v958_v14 }
 0x880   :  { %v982_v31 = vsel %vm981_vm9, %v951_v25, %v980_v28 }
 0x881   :  { %v984_v32 = vsel %vm983_vm10, %v960_v47, %v982_v31 }
 0x882   :  { %v986_v33 = vsel %vm962_vm11, -99999.0, %v984_v32 }
 0x883   :  { %987 = vmax.xlane.f32.xlu0 %v986_v33 }
 0x899   :  { %998 = vrot.lane.b32.xlu0 %v1820_v62, %s1597_s23  ;;  %s1527_s23 = scalar_lea.vmem %s1023_s27, 128 }
 0x89a   :  { %p1528_p0 = scmp.ne.s32.totalorder %s1023_s27, %s1527_s23  ;;  %p1533_p2 = scmp.lt.s32.totalorder %s1527_s23, %s1527_s23 }
 0x89c   :  { %p1534_p3 = por %p1533_p2, %p1532_p1 }
 0x89e   :  { %p1535_p4 = pnand %p1534_p3, %p1528_p0 }
 0x910   :  { %v988_v1 = vpop.xlane.xlu0 %987 }
 0x911   :  { %v989_v35 = vsub.f32 %v986_v33, %v988_v1 }
 0x913   :  { %v990_v34 = vmul.f32 1.442695, %v989_v35 }
 0x914   :  { %v999_v16 = vpop.permute.xlu0 %998 }
 0x915   :  { %1369 = vpow2.f32 %v990_v34  ;;  %v1004_v37 = vsel %vm1003_vm12, %v1002_v36, %v999_v16 }
 0x916   :  { %1005 = vst [vmem:[#allocation15] sm:$0xff] %v1004_v37 }
 0x91f   :  { %v1370_v38 = vpop.eup %1369 }
 0x920   :  { %992 = vadd.xlane.f32.xlu1 %v1370_v38 }
 0x921   :  { %1538 = shalt.err (!%p1535_p4)
}
 0x922   :  { %s1539_s29 = scalar_lea.hbm %s2024_s15, 128 }
 0x923   :  { %p1540_p5 = scmp.ne.s32.totalorder %s2024_s15, %s1539_s29  ;;  %p1543_p6 = scmp.lt.u32.totalorder %s1539_s29, %s2024_s15 }
 0x925   :  { %p1545_p7 = pnand %p1543_p6, %p1540_p5 }
 0x927   :  { %1548 = shalt.err (!%p1545_p7)
}
 0x928   :  { %1025 = dma.vmem_to_hbm [thread:$0]  %s1023_s27, 128, %s2024_s15, [#allocation16]  }
 0x929   :  { %s1599_s10 = smov [#allocation14]  }
 0x92a   :  { %s1012_s22 = sshll.u32 %s1599_s10, 4  ;;  %s1013_s22 = int_to_ptr.vmem [resolvable:$true] %s1012_s22 }
 0x92b   :  { %s1549_s7 = scalar_lea.vmem %s1013_s22, 128  ;;  %p1554_p9 = scmp.lt.s32.totalorder %s1013_s22, %s1013_s22 }
 0x92c   :  { %p1550_p8 = scmp.ne.s32.totalorder %s1013_s22, %s1549_s7  ;;  %p1555_p10 = scmp.lt.s32.totalorder %s1549_s7, %s1549_s7 }
 0x92e   :  { %p1556_p11 = por %p1555_p10, %p1554_p9 }
 0x930   :  { %p1557_p12 = pnand %p1556_p11, %p1550_p8 }
 0x9ad   :  { %v993_v29 = vpop.xlane.xlu1 %992 }
 0x9ae   :  { %1371 = vrcp.f32 %v993_v29 }
 0x9b8   :  { %v1372_v46 = vpop.eup %1371 }
 0x9b9   :  { %v995_v62 = vmul.f32 %v1372_v46, %v1370_v38 }
 0x9bb   :  { %996 = vst [vmem:[#allocation14] sm:$0xff] %v995_v62 }
 0x9bc   :  { %1560 = shalt.err (!%p1557_p12)
}
 0x9bd   :  { %s1561_s26 = scalar_lea.hbm %s2023_s14, 128 }
 0x9be   :  { %p1562_p13 = scmp.ne.s32.totalorder %s2023_s14, %s1561_s26  ;;  %p1565_p0 = scmp.lt.u32.totalorder %s1561_s26, %s2023_s14 }
 0x9c0   :  { %p1567_p1 = pnand %p1565_p0, %p1562_p13 }
 0x9c2   :  { %1570 = shalt.err (!%p1567_p1)
}
 0x9c3   :  { %1015 = dma.vmem_to_hbm [thread:$0]  %s1013_s22, 128, %s2023_s14, [#allocation4]  }
 0x9c4   :  { %1579 = dma.done.wait [#allocation4], 128  }
 0x9c5   :  { %1580 = vsyncadd [#allocation4], 4294967168 }
 0x9c6   :  { %1581 = dma.done.wait [#allocation16], 128  }
 0x9c7   :  { %1582 = vsyncadd [#allocation16], 4294967168 }
 0x9c8   :  { %1032 = vsyncpa [#allocation3], 1 }
 0x9c9   :  { %1033 = vsyncpa [#allocation6], 1 }
 0x9ca   :  { %1034 = vsyncpa [#allocation9], 1 }
 0x9cb   :  { %1035 = vsyncpa [#allocation12], 1 }
 0x9cc   :  { %1036 = vsyncpa [#allocation4], 1 }
 0x9cd   :  { %1037 = vsyncpa [#allocation16], 1 }

</bundles_post_ra>
